<compile_context>
chip_gen: v5e
topology: v5e:2x2
jax: 0.10.0
libtpu: 0.0.40
codegen_flags: <defaults>
</compile_context>

<pallas_src>
import functools

import jax
import jax.numpy as jnp
import numpy as np
from jax import lax
from jax.experimental import pallas as pl
from jax.experimental.pallas import tpu as pltpu


def _round_up(a, b):
    return (a + b - 1) // b * b


# ----------------------------------------------------------------------------
# Fused kernel: 3x3 conv (9 shifted-window MXU matmuls, K=Cin each) +
# BatchNorm2d (training batch stats, one-sweep sum/sumsq) + ReLU.
# Grid = (cout_blocks, N); output block is VMEM-resident across the N axis.
# ----------------------------------------------------------------------------
def _cell_fused_kernel(x_ref, w_ref, mask_ref, o_ref, sum_ref, sumsq_ref,
                       *, cin, wp, lw, n_total, count, eps):
    # x_ref:    (1, Cin, Lpad)      padded+flattened image for batch n
    # w_ref:    (Cout_blk, 9*Cin)   conv weight, tap-major then Cin
    # mask_ref: (1, Lw)             1.0 on valid output columns, 0.0 on garbage
    # o_ref:    (N, Cout_blk, Lw)   wide-layout output, resident across n
    # sum/sumsq_ref: (Cout_blk, 1)  per-channel BN partial sums (VMEM scratch)
    n = pl.program_id(1)

    @pl.when(n == 0)
    def _init():
        sum_ref[...] = jnp.zeros_like(sum_ref)
        sumsq_ref[...] = jnp.zeros_like(sumsq_ref)

    x = x_ref[0]                                   # (Cin, Lpad), VMEM resident
    wmat = w_ref[...]                              # (Cout_blk, 9*Cin)
    cout_blk = o_ref.shape[1]

    # --- Conv2d(3x3, s=1, p=1) as 9 shifted-window matmuls on the MXU ------
    acc = jnp.zeros((cout_blk, lw), jnp.float32)
    for kh in range(3):
        for kw in range(3):
            tap = kh * 3 + kw
            shift = kh * wp + kw                   # static lane shift
            x_shift = x[:, shift:shift + lw]       # (Cin, Lw) static slice
            w_tap = wmat[:, tap * cin:(tap + 1) * cin]   # (Cout_blk, Cin)
            acc = acc + jnp.dot(w_tap, x_shift,
                                preferred_element_type=jnp.float32)

    # Store this image's conv output into the resident output block
    # (Lw is a multiple of 128 -> unmasked full-lane stores).
    o_ref[n] = acc

    # --- One-sweep BN partial statistics (mask drops wide-layout garbage) --
    maskf = mask_ref[...]                          # (1, Lw)
    av = acc * maskf
    sum_ref[...] += jnp.sum(av, axis=1, keepdims=True)
    sumsq_ref[...] += jnp.sum(av * acc, axis=1, keepdims=True)

    # --- Finalize: normalize + ReLU the whole resident output block --------
    @pl.when(n == n_total - 1)
    def _finalize():
        inv_count = 1.0 / count
        mean = sum_ref[...] * inv_count                     # (Cout_blk, 1)
        var = sumsq_ref[...] * inv_count - mean * mean      # biased variance
        inv = lax.rsqrt(var + eps)
        y = o_ref[...]                                      # (N, Cout_blk, Lw)
        z = (y - mean[None, :, :]) * inv[None, :, :]
        o_ref[...] = jnp.maximum(z, 0.0)


# ----------------------------------------------------------------------------
# Cell wrapper (BasicCell forward: activation(normalization(conv(x))))
# ----------------------------------------------------------------------------
@jax.jit
def cell_forward(x_nchw, w_oihw):
    """x_nchw: (N, Cin, H, W); w_oihw: (Cout, Cin, 3, 3). Returns (N, Cout, H, W)."""
    N, Cin, H, W = x_nchw.shape
    Cout = w_oihw.shape[0]
    Hp, Wp = H + 2, W + 2
    Lw = _round_up(H * Wp, 128)                    # wide (lane-dense) output width
    max_shift = 2 * Wp + 2                         # largest tap shift (kh=kw=2)
    Lpad = _round_up(max(Hp * Wp, max_shift + Lw), 128)

    x = x_nchw.astype(jnp.float32)
    w = w_oihw.astype(jnp.float32)

    # Layout glue (1x data, no im2col inflation): zero-pad spatially, flatten,
    # pad flat length so every static tap slice stays in-bounds.
    x_pad = jnp.pad(x, ((0, 0), (0, 0), (1, 1), (1, 1)))        # (N, Cin, Hp, Wp)
    x_flat = x_pad.reshape(N, Cin, Hp * Wp)
    x_flat = jnp.pad(x_flat, ((0, 0), (0, 0), (0, Lpad - Hp * Wp)))
    # w2d[o, (kh*3+kw)*Cin + c] = w[o, c, kh, kw]
    w2d = w.transpose(0, 2, 3, 1).reshape(Cout, 9 * Cin)

    # Valid-column mask for the wide layout: col j = h*Wp + w with w < W.
    col = np.arange(Lw)
    valid = (col < H * Wp) & ((col % Wp) < W)
    mask = jnp.asarray(valid, dtype=jnp.float32).reshape(1, Lw)

    # Single channel block at this size; tile Cout here for larger models.
    cout_blk = Cout
    n_cb = Cout // cout_blk

    kernel = functools.partial(
        _cell_fused_kernel, cin=Cin, wp=Wp, lw=Lw, n_total=N,
        count=float(N * H * W), eps=1e-5)

    flops = 2 * N * H * W * Cout * 9 * Cin
    bytes_accessed = (x_flat.size + w2d.size + N * Cout * Lw) * 4

    out_wide = pl.pallas_call(
        kernel,
        out_shape=jax.ShapeDtypeStruct((N, Cout, Lw), jnp.float32),
        grid_spec=pltpu.PrefetchScalarGridSpec(
            num_scalar_prefetch=0,
            grid=(n_cb, N),
            in_specs=[
                pl.BlockSpec((1, Cin, Lpad), lambda cb, n: (n, 0, 0)),
                pl.BlockSpec((cout_blk, 9 * Cin), lambda cb, n: (cb, 0)),
                pl.BlockSpec((1, Lw), lambda cb, n: (0, 0)),
            ],
            out_specs=pl.BlockSpec((N, cout_blk, Lw), lambda cb, n: (0, cb, 0)),
            scratch_shapes=[pltpu.VMEM((cout_blk, 1), jnp.float32),
                            pltpu.VMEM((cout_blk, 1), jnp.float32)],
        ),
        compiler_params=pltpu.CompilerParams(
            dimension_semantics=("parallel", "arbitrary")),
        cost_estimate=pl.CostEstimate(
            flops=flops, transcendentals=0, bytes_accessed=bytes_accessed),
    )(x_flat, w2d, mask)

    # Cheap crop of the wide layout back to NCHW (1x data, plain XLA slice).
    out = out_wide[:, :, :H * Wp].reshape(N, Cout, H, Wp)[:, :, :, :W]
    return out


# ----------------------------------------------------------------------------
# Pure-JAX reference for verification
# ----------------------------------------------------------------------------
def cell_reference(x_nchw, w_oihw):
    y = lax.conv_general_dilated(
        x_nchw.astype(jnp.float32), w_oihw.astype(jnp.float32),
        window_strides=(1, 1), padding=((1, 1), (1, 1)),
        dimension_numbers=('NCHW', 'OIHW', 'NCHW'))
    mean = jnp.mean(y, axis=(0, 2, 3), keepdims=True)
    var = jnp.mean((y - mean) ** 2, axis=(0, 2, 3), keepdims=True)
    z = (y - mean) * lax.rsqrt(var + 1e-5)
    return jnp.maximum(z, 0.0)


if __name__ == "__main__":
    # Small shapes consistent with the module: batch=2, Cin=4, Cout=8, 16x16
    N, Cin, Cout, H, W = 2, 4, 8, 16, 16
    key = jax.random.PRNGKey(0)
    kx, kw = jax.random.split(key)
    x = jax.random.normal(kx, (N, Cin, H, W), dtype=jnp.float32)
    # Deterministic Conv2d weight (Cout, Cin, 3, 3), kaiming-ish scale
    w = jax.random.normal(kw, (Cout, Cin, 3, 3), dtype=jnp.float32) * 0.1

    out = jax.block_until_ready(cell_forward(x, w))
    ref = jax.block_until_ready(cell_reference(x, w))

    np.testing.assert_allclose(np.asarray(out), np.asarray(ref),
                               rtol=1e-4, atol=1e-4)
    assert out.shape == (N, Cout, H, W)
    print("KERNEL_OK")
</pallas_src>

<mosaic_0001>
module attributes {stable_mosaic.version = 11 : i64} {
  func.func @_cell_fused_kernel(%arg0: i32, %arg1: i32, %arg2: memref<1x4x512xf32, #tpu.memory_space<vmem>>, %arg3: memref<8x36xf32, #tpu.memory_space<vmem>>, %arg4: memref<1x384xf32, #tpu.memory_space<vmem>>, %arg5: memref<2x8x384xf32, #tpu.memory_space<vmem>>, %arg6: memref<8x1xf32, #tpu.memory_space<vmem>>, %arg7: memref<8x1xf32, #tpu.memory_space<vmem>>) attributes {dimension_semantics = [#tpu.dimension_semantics<parallel>, #tpu.dimension_semantics<arbitrary>], iteration_bounds = array<i64: 1, 2>, scalar_prefetch = 0 : i64, scratch_operands = 2 : i64, tpu.core_type = #tpu.core_type<tc>, window_params = [{transform_indices = @transform_0, window_bounds = array<i64: 1, 4, 512>}, {transform_indices = @transform_1, window_bounds = array<i64: 8, 36>}, {pipeline_mode = #tpu.pipeline_mode<synchronous>, transform_indices = @transform_2, window_bounds = array<i64: 1, 384>}, {transform_indices = @transform_3, window_bounds = array<i64: 2, 8, 384>}]} {
    %c0_i32 = arith.constant 0 : i32
    %0 = arith.cmpi eq, %arg1, %c0_i32 : i32
    %1 = arith.extui %0 : i1 to i32
    %c0_i32_0 = arith.constant 0 : i32
    %2 = arith.cmpi ne, %1, %c0_i32_0 : i32
    scf.if %2 {
      %cst_29 = arith.constant 0.000000e+00 : f32
      %64 = vector.broadcast %cst_29 : f32 to vector<8x1xf32>
      %c0_30 = arith.constant 0 : index
      %c0_31 = arith.constant 0 : index
      %65 = vector.load %arg6[%c0_30, %c0_31] : memref<8x1xf32, #tpu.memory_space<vmem>>, vector<8x1xf32>
      tpu.vector_store %arg6[%c0_30, %c0_31], %64 {strides = array<i32>} : memref<8x1xf32, #tpu.memory_space<vmem>>, vector<8x1xf32>,
      %cst_32 = arith.constant 0.000000e+00 : f32
      %66 = vector.broadcast %cst_32 : f32 to vector<8x1xf32>
      %c0_33 = arith.constant 0 : index
      %c0_34 = arith.constant 0 : index
      %67 = vector.load %arg7[%c0_33, %c0_34] : memref<8x1xf32, #tpu.memory_space<vmem>>, vector<8x1xf32>
      tpu.vector_store %arg7[%c0_33, %c0_34], %66 {strides = array<i32>} : memref<8x1xf32, #tpu.memory_space<vmem>>, vector<8x1xf32>,
    } else {
    }
    %c0 = arith.constant 0 : index
    %c0_1 = arith.constant 0 : index
    %c0_2 = arith.constant 0 : index
    %3 = vector.load %arg2[%c0, %c0_1, %c0_2] : memref<1x4x512xf32, #tpu.memory_space<vmem>>, vector<1x4x512xf32>
    %4 = vector.shape_cast %3 : vector<1x4x512xf32> to vector<4x512xf32>
    %c0_3 = arith.constant 0 : index
    %c0_4 = arith.constant 0 : index
    %5 = vector.load %arg3[%c0_3, %c0_4] : memref<8x36xf32, #tpu.memory_space<vmem>>, vector<8x36xf32>
    %cst = arith.constant 0.000000e+00 : f32
    %6 = vector.broadcast %cst : f32 to vector<8x384xf32>
    %7 = vector.extract_strided_slice %4 {offsets = [0, 0], sizes = [4, 384], strides = [1, 1]} : vector<4x512xf32> to vector<4x384xf32>
    %8 = vector.extract_strided_slice %5 {offsets = [0, 0], sizes = [8, 4], strides = [1, 1]} : vector<8x36xf32> to vector<8x4xf32>
    %cst_5 = arith.constant dense<0.000000e+00> : vector<8x384xf32>
    %9 = tpu.matmul %8, %7, %cst_5 {dimension_numbers = #tpu.dot_dimension_numbers<[1], [0], [0], [1], [0, 0, 1, 1], [], []>} : vector<8x4xf32>, vector<4x384xf32>, vector<8x384xf32> -> vector<8x384xf32>
    %10 = arith.addf %6, %9 : vector<8x384xf32>
    %11 = vector.extract_strided_slice %4 {offsets = [0, 1], sizes = [4, 384], strides = [1, 1]} : vector<4x512xf32> to vector<4x384xf32>
    %12 = vector.extract_strided_slice %5 {offsets = [0, 4], sizes = [8, 4], strides = [1, 1]} : vector<8x36xf32> to vector<8x4xf32>
    %cst_6 = arith.constant dense<0.000000e+00> : vector<8x384xf32>
    %13 = tpu.matmul %12, %11, %cst_6 {dimension_numbers = #tpu.dot_dimension_numbers<[1], [0], [0], [1], [0, 0, 1, 1], [], []>} : vector<8x4xf32>, vector<4x384xf32>, vector<8x384xf32> -> vector<8x384xf32>
    %14 = arith.addf %10, %13 : vector<8x384xf32>
    %15 = vector.extract_strided_slice %4 {offsets = [0, 2], sizes = [4, 384], strides = [1, 1]} : vector<4x512xf32> to vector<4x384xf32>
    %16 = vector.extract_strided_slice %5 {offsets = [0, 8], sizes = [8, 4], strides = [1, 1]} : vector<8x36xf32> to vector<8x4xf32>
    %cst_7 = arith.constant dense<0.000000e+00> : vector<8x384xf32>
    %17 = tpu.matmul %16, %15, %cst_7 {dimension_numbers = #tpu.dot_dimension_numbers<[1], [0], [0], [1], [0, 0, 1, 1], [], []>} : vector<8x4xf32>, vector<4x384xf32>, vector<8x384xf32> -> vector<8x384xf32>
    %18 = arith.addf %14, %17 : vector<8x384xf32>
    %19 = vector.extract_strided_slice %4 {offsets = [0, 18], sizes = [4, 384], strides = [1, 1]} : vector<4x512xf32> to vector<4x384xf32>
    %20 = vector.extract_strided_slice %5 {offsets = [0, 12], sizes = [8, 4], strides = [1, 1]} : vector<8x36xf32> to vector<8x4xf32>
    %cst_8 = arith.constant dense<0.000000e+00> : vector<8x384xf32>
    %21 = tpu.matmul %20, %19, %cst_8 {dimension_numbers = #tpu.dot_dimension_numbers<[1], [0], [0], [1], [0, 0, 1, 1], [], []>} : vector<8x4xf32>, vector<4x384xf32>, vector<8x384xf32> -> vector<8x384xf32>
    %22 = arith.addf %18, %21 : vector<8x384xf32>
    %23 = vector.extract_strided_slice %4 {offsets = [0, 19], sizes = [4, 384], strides = [1, 1]} : vector<4x512xf32> to vector<4x384xf32>
    %24 = vector.extract_strided_slice %5 {offsets = [0, 16], sizes = [8, 4], strides = [1, 1]} : vector<8x36xf32> to vector<8x4xf32>
    %cst_9 = arith.constant dense<0.000000e+00> : vector<8x384xf32>
    %25 = tpu.matmul %24, %23, %cst_9 {dimension_numbers = #tpu.dot_dimension_numbers<[1], [0], [0], [1], [0, 0, 1, 1], [], []>} : vector<8x4xf32>, vector<4x384xf32>, vector<8x384xf32> -> vector<8x384xf32>
    %26 = arith.addf %22, %25 : vector<8x384xf32>
    %27 = vector.extract_strided_slice %4 {offsets = [0, 20], sizes = [4, 384], strides = [1, 1]} : vector<4x512xf32> to vector<4x384xf32>
    %28 = vector.extract_strided_slice %5 {offsets = [0, 20], sizes = [8, 4], strides = [1, 1]} : vector<8x36xf32> to vector<8x4xf32>
    %cst_10 = arith.constant dense<0.000000e+00> : vector<8x384xf32>
    %29 = tpu.matmul %28, %27, %cst_10 {dimension_numbers = #tpu.dot_dimension_numbers<[1], [0], [0], [1], [0, 0, 1, 1], [], []>} : vector<8x4xf32>, vector<4x384xf32>, vector<8x384xf32> -> vector<8x384xf32>
    %30 = arith.addf %26, %29 : vector<8x384xf32>
    %31 = vector.extract_strided_slice %4 {offsets = [0, 36], sizes = [4, 384], strides = [1, 1]} : vector<4x512xf32> to vector<4x384xf32>
    %32 = vector.extract_strided_slice %5 {offsets = [0, 24], sizes = [8, 4], strides = [1, 1]} : vector<8x36xf32> to vector<8x4xf32>
    %cst_11 = arith.constant dense<0.000000e+00> : vector<8x384xf32>
    %33 = tpu.matmul %32, %31, %cst_11 {dimension_numbers = #tpu.dot_dimension_numbers<[1], [0], [0], [1], [0, 0, 1, 1], [], []>} : vector<8x4xf32>, vector<4x384xf32>, vector<8x384xf32> -> vector<8x384xf32>
    %34 = arith.addf %30, %33 : vector<8x384xf32>
    %35 = vector.extract_strided_slice %4 {offsets = [0, 37], sizes = [4, 384], strides = [1, 1]} : vector<4x512xf32> to vector<4x384xf32>
    %36 = vector.extract_strided_slice %5 {offsets = [0, 28], sizes = [8, 4], strides = [1, 1]} : vector<8x36xf32> to vector<8x4xf32>
    %cst_12 = arith.constant dense<0.000000e+00> : vector<8x384xf32>
    %37 = tpu.matmul %36, %35, %cst_12 {dimension_numbers = #tpu.dot_dimension_numbers<[1], [0], [0], [1], [0, 0, 1, 1], [], []>} : vector<8x4xf32>, vector<4x384xf32>, vector<8x384xf32> -> vector<8x384xf32>
    %38 = arith.addf %34, %37 : vector<8x384xf32>
    %39 = vector.extract_strided_slice %4 {offsets = [0, 38], sizes = [4, 384], strides = [1, 1]} : vector<4x512xf32> to vector<4x384xf32>
    %40 = vector.extract_strided_slice %5 {offsets = [0, 32], sizes = [8, 4], strides = [1, 1]} : vector<8x36xf32> to vector<8x4xf32>
    %cst_13 = arith.constant dense<0.000000e+00> : vector<8x384xf32>
    %41 = tpu.matmul %40, %39, %cst_13 {dimension_numbers = #tpu.dot_dimension_numbers<[1], [0], [0], [1], [0, 0, 1, 1], [], []>} : vector<8x4xf32>, vector<4x384xf32>, vector<8x384xf32> -> vector<8x384xf32>
    %42 = arith.addf %38, %41 : vector<8x384xf32>
    %43 = arith.index_cast %arg1 : i32 to index
    %c0_14 = arith.constant 0 : index
    %c0_15 = arith.constant 0 : index
    %44 = vector.load %arg5[%43, %c0_14, %c0_15] : memref<2x8x384xf32, #tpu.memory_space<vmem>>, vector<1x8x384xf32>
    %45 = vector.shape_cast %44 : vector<1x8x384xf32> to vector<8x384xf32>
    %46 = vector.shape_cast %42 : vector<8x384xf32> to vector<1x8x384xf32>
    tpu.vector_store %arg5[%43, %c0_14, %c0_15], %46 {strides = array<i32>} : memref<2x8x384xf32, #tpu.memory_space<vmem>>, vector<1x8x384xf32>,
    %c0_16 = arith.constant 0 : index
    %c0_17 = arith.constant 0 : index
    %47 = vector.load %arg4[%c0_16, %c0_17] : memref<1x384xf32, #tpu.memory_space<vmem>>, vector<1x384xf32>
    %48 = vector.broadcast %47 : vector<1x384xf32> to vector<8x384xf32>
    %49 = arith.mulf %42, %48 : vector<8x384xf32>
    %c0_18 = arith.constant 0 : index
    %c0_19 = arith.constant 0 : index
    %50 = vector.load %arg6[%c0_18, %c0_19] : memref<8x1xf32, #tpu.memory_space<vmem>>, vector<8x1xf32>
    %cst_20 = arith.constant dense<0.000000e+00> : vector<8xf32>
    %51 = vector.multi_reduction <add>, %49, %cst_20 [1] : vector<8x384xf32> to vector<8xf32>
    %52 = vector.shape_cast %51 : vector<8xf32> to vector<8x1xf32>
    %53 = arith.addf %50, %52 : vector<8x1xf32>
    %c0_21 = arith.constant 0 : index
    %c0_22 = arith.constant 0 : index
    %54 = vector.load %arg6[%c0_21, %c0_22] : memref<8x1xf32, #tpu.memory_space<vmem>>, vector<8x1xf32>
    tpu.vector_store %arg6[%c0_21, %c0_22], %53 {strides = array<i32>} : memref<8x1xf32, #tpu.memory_space<vmem>>, vector<8x1xf32>,
    %c0_23 = arith.constant 0 : index
    %c0_24 = arith.constant 0 : index
    %55 = vector.load %arg7[%c0_23, %c0_24] : memref<8x1xf32, #tpu.memory_space<vmem>>, vector<8x1xf32>
    %56 = arith.mulf %49, %42 : vector<8x384xf32>
    %cst_25 = arith.constant dense<0.000000e+00> : vector<8xf32>
    %57 = vector.multi_reduction <add>, %56, %cst_25 [1] : vector<8x384xf32> to vector<8xf32>
    %58 = vector.shape_cast %57 : vector<8xf32> to vector<8x1xf32>
    %59 = arith.addf %55, %58 : vector<8x1xf32>
    %c0_26 = arith.constant 0 : index
    %c0_27 = arith.constant 0 : index
    %60 = vector.load %arg7[%c0_26, %c0_27] : memref<8x1xf32, #tpu.memory_space<vmem>>, vector<8x1xf32>
    tpu.vector_store %arg7[%c0_26, %c0_27], %59 {strides = array<i32>} : memref<8x1xf32, #tpu.memory_space<vmem>>, vector<8x1xf32>,
    %c1_i32 = arith.constant 1 : i32
    %61 = arith.cmpi eq, %arg1, %c1_i32 : i32
    %62 = arith.extui %61 : i1 to i32
    %c0_i32_28 = arith.constant 0 : i32
    %63 = arith.cmpi ne, %62, %c0_i32_28 : i32
    scf.if %63 {
      %c0_29 = arith.constant 0 : index
      %c0_30 = arith.constant 0 : index
      %64 = vector.load %arg6[%c0_29, %c0_30] : memref<8x1xf32, #tpu.memory_space<vmem>>, vector<8x1xf32>
      %cst_31 = arith.constant 0.001953125 : f32
      %65 = vector.broadcast %cst_31 : f32 to vector<8x1xf32>
      %66 = arith.mulf %64, %65 : vector<8x1xf32>
      %c0_32 = arith.constant 0 : index
      %c0_33 = arith.constant 0 : index
      %67 = vector.load %arg7[%c0_32, %c0_33] : memref<8x1xf32, #tpu.memory_space<vmem>>, vector<8x1xf32>
      %cst_34 = arith.constant 0.001953125 : f32
      %68 = vector.broadcast %cst_34 : f32 to vector<8x1xf32>
      %69 = arith.mulf %67, %68 : vector<8x1xf32>
      %70 = arith.mulf %66, %66 : vector<8x1xf32>
      %71 = arith.subf %69, %70 : vector<8x1xf32>
      %cst_35 = arith.constant 9.99999974E-6 : f32
      %72 = vector.broadcast %cst_35 : f32 to vector<8x1xf32>
      %73 = arith.addf %71, %72 : vector<8x1xf32>
      %74 = math.rsqrt %73 : vector<8x1xf32>
      %c0_36 = arith.constant 0 : index
      %c0_37 = arith.constant 0 : index
      %c0_38 = arith.constant 0 : index
      %75 = vector.load %arg5[%c0_36, %c0_37, %c0_38] : memref<2x8x384xf32, #tpu.memory_space<vmem>>, vector<2x8x384xf32>
      %76 = vector.shape_cast %66 : vector<8x1xf32> to vector<1x8x1xf32>
      %77 = vector.broadcast %76 : vector<1x8x1xf32> to vector<2x8x384xf32>
      %78 = arith.subf %75, %77 : vector<2x8x384xf32>
      %79 = vector.shape_cast %74 : vector<8x1xf32> to vector<1x8x1xf32>
      %80 = vector.broadcast %79 : vector<1x8x1xf32> to vector<2x8x384xf32>
      %81 = arith.mulf %78, %80 : vector<2x8x384xf32>
      %cst_39 = arith.constant 0.000000e+00 : f32
      %82 = vector.broadcast %cst_39 : f32 to vector<2x8x384xf32>
      %83 = arith.maximumf %81, %82 : vector<2x8x384xf32>
      %c0_40 = arith.constant 0 : index
      %c0_41 = arith.constant 0 : index
      %c0_42 = arith.constant 0 : index
      %84 = vector.load %arg5[%c0_40, %c0_41, %c0_42] : memref<2x8x384xf32, #tpu.memory_space<vmem>>, vector<2x8x384xf32>
      tpu.vector_store %arg5[%c0_40, %c0_41, %c0_42], %83 {strides = array<i32>} : memref<2x8x384xf32, #tpu.memory_space<vmem>>, vector<2x8x384xf32>,
    } else {
    }
    return
  }
  func.func @transform_0(%arg0: i32, %arg1: i32) -> (i32, i32, i32) {
    %c0_i32 = arith.constant 0 : i32
    %c0_i32_0 = arith.constant 0 : i32
    %c0_i32_1 = arith.constant 0 : i32
    return %arg1, %c0_i32, %c0_i32_0 : i32, i32, i32
  }
  func.func @transform_1(%arg0: i32, %arg1: i32) -> (i32, i32) {
    %c0_i32 = arith.constant 0 : i32
    %c0_i32_0 = arith.constant 0 : i32
    return %arg0, %c0_i32 : i32, i32
  }
  func.func @transform_2(%arg0: i32, %arg1: i32) -> (i32, i32) {
    %c0_i32 = arith.constant 0 : i32
    %c0_i32_0 = arith.constant 0 : i32
    %c0_i32_1 = arith.constant 0 : i32
    return %c0_i32, %c0_i32_0 : i32, i32
  }
  func.func @transform_3(%arg0: i32, %arg1: i32) -> (i32, i32, i32) {
    %c0_i32 = arith.constant 0 : i32
    %c0_i32_0 = arith.constant 0 : i32
    %c0_i32_1 = arith.constant 0 : i32
    return %c0_i32, %arg0, %c0_i32_0 : i32, i32, i32
  }
}

</mosaic_0001>

<bundles_post_ra>
// kernel: cell_forward.1
= control target key start
LH: loop header
LB: loop body
LE: loop exit
PB: predicated region body
PF: predicated region fallthrough
CT: control target
= control target key end

     0   :  { %s1370_s12 = smov 0   ;;  %s1372_s13 = smov 0   ;;  %s1553_s0 = inlined_call_operand.vmem [shape: f32[2,4,512], index: 0, kind: input, shape index: {}]   ;;  %s1554_s1 = inlined_call_operand.vmem [shape: f32[8,36], index: 1, kind: input, shape index: {}]   ;;  %s1555_s2 = inlined_call_operand.vmem [shape: f32[1,384], index: 2, kind: input, shape index: {}]   ;;  %s1556_s3 = inlined_call_operand.vmem [shape: f32[2,8,384], index: 3, kind: output, shape index: {}]  }
   0x1   :  { %s1374_s14 = smov 0  }
   0x2 LB: > { %s22_s15 = sadd.s32 1, %s1327_s13  ;;  %p1200_p0 = scmp.ge.s32.totalorder %s1331_s14, 1  ;;  %s1331_s14 = sphi %s1374_s14, %s13_s14   ;;  %s1327_s13 = sphi %s1372_s13, %s1558_s13   ;;  %s1323_s12 = sphi %s1370_s12, %s1557_s12  }
   0x3   : > { %p23_p1 = scmp.ge.s32.totalorder %s22_s15, 2  ;;  %p158_p2 = scmp.lt.s32.totalorder %s1331_s14, 3 }
   0x5   : > { %s1560_s15 = smov (%p23_p1, %s22_s15), 0  ;;  %p159_p3 = pnand %p1200_p0, %p158_p2 }
   0x6   : > { %p186_p4 = scmp.lt.s32.totalorder (!%p159_p3), %s1323_s12, 1  ;;  %p1203_p5 = scmp.ne.s32.totalorder (!%p159_p3), %s1323_s12, 0 }
   0x7   : > { %162 = sbr.rel (%p159_p3) target bundleno = 663 (0x297), region = 32 }
   0xc   : > { %s187_s16 = scalar_select %p186_p4, %s1323_s12, 1 }
   0xd   : > { %203 = sbr.rel (%p1203_p5) target bundleno = 21 (0x15), region = 36 }
   0xe   : > { %s1263_s17 = sshll.u32 %s187_s16, 4 }
   0xf   : > { %s190_s20 = scalar_lea.vmem %s1553_s0, %s1263_s17 }
  0x12   : > { %vm204_vm0 = vcmask 7168   ;;  %v1333_v0 = vmov 0.0  }
  0x13   : > { %205 = vst.msk [vmem:[#allocation2] sm:$0xff] %vm204_vm0, %v1333_v0 }
  0x14   : > { %206 = vst.msk [vmem:[#allocation3] sm:$0xff] %vm204_vm0, %v1333_v0 }
  0x15 PF: > { %v1399_v1 = vld [vmem:[%s1554_s1] sm:$0xff]  ;;  %v1401_v2 = vld [vmem:[%s190_s20 + $0x8] sm:$0xff]  ;;  %s1334_s23 = smov 124   ;;  %s1335_s24 = smov 116   ;;  %vm237_vm1 = vcmask 1043456   ;;  %vm234_vm2 = vcmask 31744  }
  0x16   : > { %v1403_v3 = vld [vmem:[%s190_s20] sm:$0xff]  ;;  %211 = vrot.lane.b32.xlu1 %v1399_v1, %s1334_s23  ;;  %217 = vst [vmem:[#allocation1 + $0x10] ss:$2 sm:$0xff] %v1401_v2  ;;  %470 = vrot.lane.b32.xlu2 %v1399_v1, %s1335_s24  ;;  %s1336_s25 = smov 127   ;;  %s1337_s26 = smov 120   ;;  %vm230_vm3 = vcmask 1039360  }
  0x17   : > { %215 = vst [vmem:[#allocation1] ss:$2 sm:$0xff] %v1403_v3  ;;  %s1338_s27 = smov 126   ;;  %s1339_s28 = smov 110   ;;  %vm395_vm4 = vcmask 1031168   ;;  %vm487_vm5 = vcmask 900096  }
  0x18   : > { %s1340_s29 = smov 109   ;;  %s1341_s30 = smov 112   ;;  %vm579_vm6 = vcmask 891904   ;;  %vm671_vm7 = vcmask 883712   ;;  %vm763_vm8 = vcmask 752640   ;;  %vm855_vm9 = vcmask 744448  }
  0x19   : > { %s1342_s4 = smov 108   ;;  %s1343_s5 = smov 92   ;;  %vm947_vm10 = vcmask 736256   ;;  %vm1045_vm11 = vcmask 7168  }
  0x1a   : > { %s1344_s6 = smov 104   ;;  %s1345_s7 = smov 91  }
  0x1b   : > { %s1346_s8 = smov 100   ;;  %s1347_s9 = smov 90  }
  0x1c   : > { %s1348_s10 = smov 96   ;;  %s1264_s11 = smul.u32 24, %s1323_s12 }
  0x1d   : > { %v220_v4 = vld.sshfl [vmem:[#allocation1 + $0x10] sm:$0xff pattern:$0x75316420]  ;;  %v221_v5 = vld.sshfl [vmem:[#allocation1 + $0x18] sm:$0xff pattern:$0x75316420] }
  0x1e   : > { %226 = vrot.lane.b32.xlu0 %v220_v4, %s1336_s25  ;;  %v218_v6 = vld.sshfl [vmem:[#allocation1] sm:$0xff pattern:$0x75316420]  ;;  %v219_v7 = vld.sshfl [vmem:[#allocation1 + $0x8] sm:$0xff pattern:$0x75316420]  ;;  %s1024_s20 = scalar_lea.vmem %s1556_s3, %s1264_s11 }
  0x1f   : > { %222 = vrot.lane.b32.xlu1 %v218_v6, %s1336_s25  ;;  %304 = vst [vmem:[#allocation1] ss:$2 sm:$0xff] %v1403_v3  ;;  %224 = vrot.lane.b32.xlu2 %v219_v7, %s1336_s25  ;;  %p1259_p6 = scmp.ne.s32.totalorder %s1323_s12, 1 }
  0x20   : > { %306 = vst [vmem:[#allocation1 + $0x10] ss:$2 sm:$0xff] %v1401_v2 }
  0x26   : > { %v1411_v8 = vld.sshfl [vmem:[#allocation1] sm:$0xff pattern:$0x75316420]  ;;  %v1413_v9 = vld.sshfl [vmem:[#allocation1 + $0x8] sm:$0xff pattern:$0x75316420]  ;;  %228 = vrot.lane.b32.xlu0 %v221_v5, %s1336_s25 }
  0x27   : > { %380 = vst [vmem:[#allocation1] ss:$2 sm:$0xff] %v1403_v3  ;;  %v1416_v10 = vld.sshfl [vmem:[#allocation1 + $0x10] sm:$0xff pattern:$0x75316420]  ;;  %378 = vrot.lane.b32.xlu1 %v1399_v1, %s1337_s26  ;;  %1210 = vmatpush.msk.msra.mxu3 %vm237_vm1, %v1411_v8 }
  0x28   : > { %382 = vst [vmem:[#allocation1 + $0x10] ss:$2 sm:$0xff] %v1401_v2  ;;  %1211 = vmatmul.msk.f32.vlgmr.msra.gmra.mxu3 %vm234_vm2, %v1399_v1 }
  0x2e   : > { %v384_v11 = vld.sshfl [vmem:[#allocation1 + $0x8] sm:$0xff pattern:$0x75316420]  ;;  %v383_v12 = vld.sshfl [vmem:[#allocation1] sm:$0xff pattern:$0x75316420] }
  0x2f   : > { %v385_v13 = vld.sshfl [vmem:[#allocation1 + $0x10] sm:$0xff pattern:$0x75316420]  ;;  %v386_v14 = vld.sshfl [vmem:[#allocation1 + $0x18] sm:$0xff pattern:$0x75316420]  ;;  %389 = vrot.lane.b32.xlu0 %v384_v11, %s1338_s27  ;;  %387 = vrot.lane.b32.xlu2 %v383_v12, %s1338_s27 }
  0x30   : > { %474 = vst [vmem:[#allocation1 + $0x10] ss:$2 sm:$0xff] %v1401_v2 }
  0x31   : > { %472 = vst [vmem:[#allocation1] ss:$2 sm:$0xff] %v1403_v3 }
  0x37   : > { %v477_v15 = vld.sshfl [vmem:[#allocation1 + $0x10] sm:$0xff pattern:$0x75316420]  ;;  %v478_v16 = vld.sshfl [vmem:[#allocation1 + $0x18] sm:$0xff pattern:$0x75316420]  ;;  %393 = vrot.lane.b32.xlu0 %v386_v14, %s1338_s27  ;;  %391 = vrot.lane.b32.xlu2 %v385_v13, %s1338_s27 }
  0x38   : > { %566 = vst [vmem:[#allocation1 + $0x10] ss:$2 sm:$0xff] %v1401_v2  ;;  %483 = vrot.lane.b32.xlu1 %v477_v15, %s1339_s28  ;;  %v476_v17 = vld.sshfl [vmem:[#allocation1 + $0x8] sm:$0xff pattern:$0x75316420] }
  0x39   : > { %v475_v18 = vld.sshfl [vmem:[#allocation1] sm:$0xff pattern:$0x75316420] }
  0x3a   : > { %564 = vst [vmem:[#allocation1] ss:$2 sm:$0xff] %v1403_v3 }
  0x3f   : > { %481 = vrot.lane.b32.xlu0 %v476_v17, %s1339_s28  ;;  %v569_v19 = vld.sshfl [vmem:[#allocation1 + $0x10] sm:$0xff pattern:$0x75316420]  ;;  %v570_v20 = vld.sshfl [vmem:[#allocation1 + $0x18] sm:$0xff pattern:$0x75316420]  ;;  %485 = vrot.lane.b32.xlu2 %v478_v16, %s1339_s28 }
  0x40   : > { %479 = vrot.lane.b32.xlu1 %v475_v18, %s1339_s28  ;;  %658 = vst [vmem:[#allocation1 + $0x10] ss:$2 sm:$0xff] %v1401_v2 }
  0x41   : > { %v568_v21 = vld.sshfl [vmem:[#allocation1 + $0x8] sm:$0xff pattern:$0x75316420]  ;;  %v567_v22 = vld.sshfl [vmem:[#allocation1] sm:$0xff pattern:$0x75316420] }
  0x42   : > { %656 = vst [vmem:[#allocation1] ss:$2 sm:$0xff] %v1403_v3 }
  0x47   : > { %575 = vrot.lane.b32.xlu0 %v569_v19, %s1340_s29  ;;  %v661_v23 = vld.sshfl [vmem:[#allocation1 + $0x10] sm:$0xff pattern:$0x75316420]  ;;  %v662_v24 = vld.sshfl [vmem:[#allocation1 + $0x18] sm:$0xff pattern:$0x75316420]  ;;  %562 = vrot.lane.b32.xlu2 %v1399_v1, %s1341_s30 }
  0x48   : > { %577 = vrot.lane.b32.xlu1 %v570_v20, %s1340_s29  ;;  %750 = vst [vmem:[#allocation1 + $0x10] ss:$2 sm:$0xff] %v1401_v2 }
  0x49   : > { %v660_v25 = vld.sshfl [vmem:[#allocation1 + $0x8] sm:$0xff pattern:$0x75316420]  ;;  %v659_v26 = vld.sshfl [vmem:[#allocation1] sm:$0xff pattern:$0x75316420] }
  0x4a   : > { %748 = vst [vmem:[#allocation1] ss:$2 sm:$0xff] %v1403_v3 }
  0x4f   : > { %571 = vrot.lane.b32.xlu0 %v567_v22, %s1340_s29  ;;  %663 = vrot.lane.b32.xlu2 %v659_v26, %s1342_s4  ;;  %v753_v27 = vld.sshfl [vmem:[#allocation1 + $0x10] sm:$0xff pattern:$0x75316420]  ;;  %v754_v28 = vld.sshfl [vmem:[#allocation1 + $0x18] sm:$0xff pattern:$0x75316420] }
  0x50   : > { %573 = vrot.lane.b32.xlu1 %v568_v21, %s1340_s29  ;;  %842 = vst [vmem:[#allocation1 + $0x10] ss:$2 sm:$0xff] %v1401_v2 }
  0x51   : > { %v752_v29 = vld.sshfl [vmem:[#allocation1 + $0x8] sm:$0xff pattern:$0x75316420]  ;;  %v751_v30 = vld.sshfl [vmem:[#allocation1] sm:$0xff pattern:$0x75316420] }
  0x52   : > { %840 = vst [vmem:[#allocation1] ss:$2 sm:$0xff] %v1403_v3 }
  0x57   : > { %665 = vrot.lane.b32.xlu0 %v660_v25, %s1342_s4  ;;  %755 = vrot.lane.b32.xlu2 %v751_v30, %s1343_s5  ;;  %v845_v31 = vld.sshfl [vmem:[#allocation1 + $0x10] sm:$0xff pattern:$0x75316420]  ;;  %v846_v32 = vld.sshfl [vmem:[#allocation1 + $0x18] sm:$0xff pattern:$0x75316420] }
  0x58   : > { %654 = vrot.lane.b32.xlu1 %v1399_v1, %s1342_s4  ;;  %934 = vst [vmem:[#allocation1 + $0x10] ss:$2 sm:$0xff] %v1401_v2 }
  0x59   : > { %v844_v33 = vld.sshfl [vmem:[#allocation1 + $0x8] sm:$0xff pattern:$0x75316420]  ;;  %v843_v34 = vld.sshfl [vmem:[#allocation1] sm:$0xff pattern:$0x75316420] }
  0x5a   : > { %932 = vst [vmem:[#allocation1] ss:$2 sm:$0xff] %v1403_v3 }
  0x5f   : > { %757 = vrot.lane.b32.xlu0 %v752_v29, %s1343_s5  ;;  %667 = vrot.lane.b32.xlu2 %v661_v23, %s1342_s4  ;;  %v937_v35 = vld.sshfl [vmem:[#allocation1 + $0x10] sm:$0xff pattern:$0x75316420]  ;;  %v938_v37 = vld.sshfl [vmem:[#allocation1 + $0x18] sm:$0xff pattern:$0x75316420] }
  0x60   : > { %746 = vrot.lane.b32.xlu1 %v1399_v1, %s1344_s6 }
  0x61   : > { %v935_v38 = vld.sshfl [vmem:[#allocation1] sm:$0xff pattern:$0x75316420]  ;;  %v936_v40 = vld.sshfl [vmem:[#allocation1 + $0x8] sm:$0xff pattern:$0x75316420] }
  0x67   : > { %669 = vrot.lane.b32.xlu0 %v662_v24, %s1342_s4  ;;  %849 = vrot.lane.b32.xlu2 %v844_v33, %s1345_s7 }
  0x68   : > { %759 = vrot.lane.b32.xlu1 %v753_v27, %s1343_s5 }
  0x6f   : > { %851 = vrot.lane.b32.xlu0 %v845_v31, %s1345_s7  ;;  %761 = vrot.lane.b32.xlu2 %v754_v28, %s1343_s5 }
  0x70   : > { %838 = vrot.lane.b32.xlu1 %v1399_v1, %s1346_s8  ;;  %v471_v36 = vpop.permute.xlu2 %470 }
  0x77   : > { %847 = vrot.lane.b32.xlu0 %v843_v34, %s1345_s7  ;;  %943 = vrot.lane.b32.xlu2 %v937_v35, %s1347_s9 }
  0x78   : > { %853 = vrot.lane.b32.xlu1 %v846_v32, %s1345_s7 }
  0x79   : > { %v225_v39 = vpop.permute.xlu2 %224 }
  0x7f   : > { %945 = vrot.lane.b32.xlu0 %v938_v37, %s1347_s9  ;;  %939 = vrot.lane.b32.xlu2 %v935_v38, %s1347_s9 }
  0x80   : > { %930 = vrot.lane.b32.xlu1 %v1399_v1, %s1348_s10 }
  0x87   : > { %941 = vrot.lane.b32.xlu0 %v936_v40, %s1347_s9 }
  0x88   : > { %v212_v41 = vpop.permute.xlu1 %211 }
  0x89   : > { %v388_v42 = vpop.permute.xlu2 %387 }
  0x90   : > { %v227_v43 = vpop.permute.xlu0 %226 }
  0x91   : > { %v223_v44 = vpop.permute.xlu1 %222  ;;  %v232_v45 = vsel %vm230_vm3, %v225_v39, %v227_v43  ;;  %v392_v47 = vpop.permute.xlu2 %391 }
  0x92   : > { %v231_v46 = vsel %vm230_vm3, %v223_v44, %v225_v39  ;;  %1206 = vmatpush.msk.msra.mxu1 %vm237_vm1, %v232_v45 }
  0x93   : > { %1204 = vmatpush.msk.msra.mxu0 %vm237_vm1, %v231_v46  ;;  %1207 = vmatmul.msk.f32.vlgmr.msra.gmra.mxu1 %vm234_vm2, %v212_v41 }
  0x94   : > { %1205 = vmatmul.msk.f32.vlgmr.msra.gmra.mxu0 %vm234_vm2, %v212_v41  ;;  %1214 = vmatpush.msk.msrb.mxu1 %vm237_vm1, %v1416_v10 }
  0x95   : > { %1212 = vmatpush.msk.msrb.mxu0 %vm237_vm1, %v1413_v9 }
  0x98   : > { %v229_v48 = vpop.permute.xlu0 %228 }
  0x99   : > { %v233_v49 = vsel %vm230_vm3, %v227_v43, %v229_v48  ;;  %v486_v50 = vpop.permute.xlu2 %485  ;;  %v379_v51 = vpop.permute.xlu1 %378 }
  0x9a   : > { %1208 = vmatpush.msk.msra.mxu2 %vm237_vm1, %v233_v49 }
  0x9b   : > { %1209 = vmatmul.msk.f32.vlgmr.msra.gmra.mxu2 %vm234_vm2, %v212_v41  ;;  %1215 = vmatmul.msk.f32.vlgmr.msrb.gmra.mxu1 %vm234_vm2, %v1399_v1 }
  0x9c   : > { %1213 = vmatmul.msk.f32.vlgmr.msrb.gmra.mxu0 %vm234_vm2, %v1399_v1 }
  0xa1   : > { %v390_v52 = vpop.permute.xlu0 %389  ;;  %v563_v55 = vpop.permute.xlu2 %562 }
  0xa2   : > { %v396_v53 = vsel %vm395_vm4, %v388_v42, %v390_v52  ;;  %v397_v54 = vsel %vm395_vm4, %v390_v52, %v392_v47 }
  0xa3   : > { %1216 = vmatpush.msk.msrb.mxu2 %vm237_vm1, %v396_v53  ;;  %1218 = vmatpush.msk.msrb.mxu3 %vm237_vm1, %v397_v54 }
  0xa4   : > { %1217 = vmatmul.msk.f32.vlgmr.msrb.gmra.mxu2 %vm234_vm2, %v379_v51  ;;  %1219 = vmatmul.msk.f32.vlgmr.msrb.gmra.mxu3 %vm234_vm2, %v379_v51 }
  0xa9   : > { %v394_v56 = vpop.permute.xlu0 %393  ;;  %v664_v60 = vpop.permute.xlu2 %663 }
  0xaa   : > { %v484_v57 = vpop.permute.xlu1 %483  ;;  %v398_v58 = vsel %vm395_vm4, %v392_v47, %v394_v56 }
  0xab   : > { %v490_v59 = vsel %vm487_vm5, %v484_v57, %v486_v50  ;;  %1220 = vmatpush.msk.msra.mxu0 %vm237_vm1, %v398_v58  ;;  %v335_v42 = vpop.f32.mrf.mxu3 }
  0xac   : > { %1226 = vmatpush.msk.msra.mxu3 %vm237_vm1, %v490_v59  ;;  %1221 = vmatmul.msk.f32.vlgmr.msra.gmra.mxu0 %vm234_vm2, %v379_v51 }
  0xad   : > { %1227 = vmatmul.msk.f32.vlgmr.msra.gmra.mxu3 %vm234_vm2, %v471_v36 }
  0xb1   : > { %v482_v61 = vpop.permute.xlu0 %481  ;;  %v756_v3 = vpop.permute.xlu2 %755 }
  0xb2   : > { %v489_v62 = vsel %vm487_vm5, %v482_v61, %v484_v57  ;;  %v480_v63 = vpop.permute.xlu1 %479 }
  0xb3   : > { %v488_v0 = vsel %vm487_vm5, %v480_v63, %v482_v61  ;;  %1224 = vmatpush.msk.msra.mxu2 %vm237_vm1, %v489_v62 }
  0xb4   : > { %1222 = vmatpush.msk.msra.mxu1 %vm237_vm1, %v488_v0  ;;  %1225 = vmatmul.msk.f32.vlgmr.msra.gmra.mxu2 %vm234_vm2, %v471_v36 }
  0xb5   : > { %1223 = vmatmul.msk.f32.vlgmr.msra.gmra.mxu1 %vm234_vm2, %v471_v36 }
  0xb9   : > { %v576_v1 = vpop.permute.xlu0 %575  ;;  %v668_v9 = vpop.permute.xlu2 %667 }
  0xba   : > { %v578_v2 = vpop.permute.xlu1 %577 }
  0xbb   : > { %v582_v4 = vsel %vm579_vm6, %v576_v1, %v578_v2 }
  0xbc   : > { %1232 = vmatpush.msk.msrb.mxu2 %vm237_vm1, %v582_v4 }
  0xbd   : > { %1233 = vmatmul.msk.f32.vlgmr.msrb.gmra.mxu2 %vm234_vm2, %v563_v55 }
  0xc1   : > { %v572_v5 = vpop.permute.xlu0 %571  ;;  %v850_v14 = vpop.permute.xlu2 %849 }
  0xc2   : > { %v574_v6 = vpop.permute.xlu1 %573 }
  0xc3   : > { %v581_v7 = vsel %vm579_vm6, %v574_v6, %v576_v1  ;;  %v580_v8 = vsel %vm579_vm6, %v572_v5, %v574_v6 }
  0xc4   : > { %1228 = vmatpush.msk.msrb.mxu0 %vm237_vm1, %v580_v8  ;;  %1230 = vmatpush.msk.msrb.mxu1 %vm237_vm1, %v581_v7 }
  0xc5   : > { %1229 = vmatmul.msk.f32.vlgmr.msrb.gmra.mxu0 %vm234_vm2, %v563_v55  ;;  %1231 = vmatmul.msk.f32.vlgmr.msrb.gmra.mxu1 %vm234_vm2, %v563_v55 }
  0xc9   : > { %v666_v10 = vpop.permute.xlu0 %665  ;;  %v762_v18 = vpop.permute.xlu2 %761 }
  0xca   : > { %v655_v11 = vpop.permute.xlu1 %654  ;;  %v672_v12 = vsel %vm671_vm7, %v664_v60, %v666_v10  ;;  %v673_v13 = vsel %vm671_vm7, %v666_v10, %v668_v9 }
  0xcb   : > { %1234 = vmatpush.msk.msrb.mxu3 %vm237_vm1, %v672_v12  ;;  %1236 = vmatpush.msk.msra.mxu0 %vm237_vm1, %v673_v13 }
  0xcc   : > { %1235 = vmatmul.msk.f32.vlgmr.msrb.gmra.mxu3 %vm234_vm2, %v655_v11 }
  0xcd   : > { %1237 = vmatmul.msk.f32.vlgmr.msra.gmra.mxu0 %vm234_vm2, %v655_v11 }
  0xd1   : > { %v758_v15 = vpop.permute.xlu0 %757  ;;  %v944_v31 = vpop.permute.xlu2 %943 }
  0xd2   : > { %v747_v16 = vpop.permute.xlu1 %746  ;;  %v764_v17 = vsel %vm763_vm8, %v756_v3, %v758_v15 }
  0xd3   : > { %1240 = vmatpush.msk.msra.mxu2 %vm237_vm1, %v764_v17 }
  0xd4   : > { %1241 = vmatmul.msk.f32.vlgmr.msra.gmra.mxu2 %vm234_vm2, %v747_v16 }
  0xd9   : > { %v670_v19 = vpop.permute.xlu0 %669  ;;  %v940_v35 = vpop.permute.xlu2 %939 }
  0xda   : > { %v760_v20 = vpop.permute.xlu1 %759  ;;  %v674_v21 = vsel %vm671_vm7, %v668_v9, %v670_v19 }
  0xdb   : > { %v765_v22 = vsel %vm763_vm8, %v758_v15, %v760_v20  ;;  %v766_v23 = vsel %vm763_vm8, %v760_v20, %v762_v18  ;;  %1238 = vmatpush.msk.msra.mxu1 %vm237_vm1, %v674_v21  ;;  %v1028_v15 = vld [vmem:[%s1555_s2] sm:$0x7] }
  0xdc   : > { %1242 = vmatpush.msk.msra.mxu3 %vm237_vm1, %v765_v22  ;;  %1244 = vmatpush.msk.msrb.mxu0 %vm237_vm1, %v766_v23  ;;  %v1030_v20 = vperm.slane %v1028_v15, 0  ;;  %v1032_v21 = vperm.slane %v1028_v15, 2 }
  0xdd   : > { %1239 = vmatmul.msk.f32.vlgmr.msra.gmra.mxu1 %vm234_vm2, %v655_v11  ;;  %1243 = vmatmul.msk.f32.vlgmr.msra.gmra.mxu3 %vm234_vm2, %v747_v16 }
  0xde   : > { %1245 = vmatmul.msk.f32.vlgmr.msrb.gmra.mxu0 %vm234_vm2, %v747_v16 }
  0xe1   : > { %v852_v24 = vpop.permute.xlu0 %851 }
  0xe2   : > { %v839_v25 = vpop.permute.xlu1 %838  ;;  %v857_v26 = vsel %vm855_vm9, %v850_v14, %v852_v24 }
  0xe3   : > { %1248 = vmatpush.msk.msrb.mxu2 %vm237_vm1, %v857_v26 }
  0xe4   : > { %1249 = vmatmul.msk.f32.vlgmr.msrb.gmra.mxu2 %vm234_vm2, %v839_v25 }
  0xe9   : > { %v848_v27 = vpop.permute.xlu0 %847 }
  0xea   : > { %v854_v28 = vpop.permute.xlu1 %853  ;;  %v856_v29 = vsel %vm855_vm9, %v848_v27, %v850_v14 }
  0xeb   : > { %v858_v30 = vsel %vm855_vm9, %v852_v24, %v854_v28  ;;  %1246 = vmatpush.msk.msrb.mxu1 %vm237_vm1, %v856_v29 }
  0xec   : > { %1250 = vmatpush.msk.msrb.mxu3 %vm237_vm1, %v858_v30  ;;  %1247 = vmatmul.msk.f32.vlgmr.msrb.gmra.mxu1 %vm234_vm2, %v839_v25 }
  0xed   : > { %1251 = vmatmul.msk.f32.vlgmr.msrb.gmra.mxu3 %vm234_vm2, %v839_v25  ;;  %v1031_v25 = vperm.slane %v1028_v15, 1 }
  0xf1   : > { %v946_v32 = vpop.permute.xlu0 %945 }
  0xf2   : > { %v950_v33 = vsel %vm947_vm10, %v944_v31, %v946_v32  ;;  %v931_v34 = vpop.permute.xlu1 %930 }
  0xf3   : > { %1256 = vmatpush.msk.msra.mxu2 %vm237_vm1, %v950_v33 }
  0xf4   : > { %1257 = vmatmul.msk.f32.vlgmr.msra.gmra.mxu2 %vm234_vm2, %v931_v34 }
  0xf9   : > { %v942_v36 = vpop.permute.xlu0 %941 }
  0xfa   : > { %v949_v37 = vsel %vm947_vm10, %v942_v36, %v944_v31  ;;  %v948_v38 = vsel %vm947_vm10, %v940_v35, %v942_v36 }
  0xfb   : > { %1252 = vmatpush.msk.msra.mxu0 %vm237_vm1, %v948_v38  ;;  %1254 = vmatpush.msk.msra.mxu1 %vm237_vm1, %v949_v37 }
  0xfc   : > { %1253 = vmatmul.msk.f32.vlgmr.msra.gmra.mxu0 %vm234_vm2, %v931_v34  ;;  %1255 = vmatmul.msk.f32.vlgmr.msra.gmra.mxu1 %vm234_vm2, %v931_v34 }
 0x110   : > { %v281_v41 = vpop.f32.mrf.mxu1 }
 0x111   : > { %v261_v40 = vpop.f32.mrf.mxu0 }
 0x112   : > { %v336_v61 = vadd.f32 %v335_v42, %v261_v40  ;;  %v1039_v40 = vld [vmem:[#allocation2] sm:$0xff]  ;;  %v1047_v42 = vld [vmem:[#allocation3] sm:$0xff] }
 0x118   : > { %v375_v45 = vpop.f32.mrf.mxu1 }
 0x119   : > { %v355_v44 = vpop.f32.mrf.mxu0 }
 0x11a   : > { %v356_v62 = vadd.f32 %v355_v44, %v281_v41 }
 0x11e   : > { %v301_v39 = vpop.f32.mrf.mxu2 }
 0x11f   : > { %v376_v56 = vadd.f32 %v375_v45, %v301_v39 }
 0x127   : > { %v424_v43 = vpop.f32.mrf.mxu2  ;;  %v444_v46 = vpop.f32.mrf.mxu3 }
 0x128   : > { %v467_v0 = vadd.f32 %v424_v43, %v336_v61  ;;  %v468_v1 = vadd.f32 %v444_v46, %v356_v62 }
 0x129   : > { %v464_v48 = vpop.f32.mrf.mxu0 }
 0x12a   : > { %v469_v59 = vadd.f32 %v464_v48, %v376_v56 }
 0x130   : > { %v556_v50 = vpop.f32.mrf.mxu3 }
 0x131   : > { %v561_v63 = vadd.f32 %v556_v50, %v469_v59 }
 0x132   : > { %v516_v49 = vpop.f32.mrf.mxu1 }
 0x133   : > { %v559_v4 = vadd.f32 %v516_v49, %v467_v0 }
 0x137   : > { %v536_v47 = vpop.f32.mrf.mxu2 }
 0x138   : > { %v560_v5 = vadd.f32 %v536_v47, %v468_v1 }
 0x140   : > { %v648_v51 = vpop.f32.mrf.mxu2 }
 0x141   : > { %v653_v2 = vadd.f32 %v648_v51, %v561_v63 }
 0x142   : > { %v608_v52 = vpop.f32.mrf.mxu0  ;;  %v628_v53 = vpop.f32.mrf.mxu1 }
 0x143   : > { %v651_v9 = vadd.f32 %v608_v52, %v559_v4  ;;  %v652_v10 = vadd.f32 %v628_v53, %v560_v5 }
 0x14a   : > { %v720_v57 = vpop.f32.mrf.mxu0 }
 0x14b   : > { %v744_v12 = vadd.f32 %v720_v57, %v652_v10 }
 0x14f   : > { %v700_v54 = vpop.f32.mrf.mxu3 }
 0x150   : > { %v743_v13 = vadd.f32 %v700_v54, %v651_v9 }
 0x157   : > { %v792_v55 = vpop.f32.mrf.mxu2 }
 0x158   : > { %v835_v16 = vadd.f32 %v792_v55, %v743_v13 }
 0x15a   : > { %v740_v58 = vpop.f32.mrf.mxu1 }
 0x15b   : > { %v745_v6 = vadd.f32 %v740_v58, %v653_v2  ;;  %v832_v7 = vpop.f32.mrf.mxu0 }
 0x15d   : > { %v837_v14 = vadd.f32 %v832_v7, %v745_v6 }
 0x160   : > { %v812_v60 = vpop.f32.mrf.mxu3 }
 0x161   : > { %v836_v17 = vadd.f32 %v812_v60, %v744_v12 }
 0x167   : > { %v904_v3 = vpop.f32.mrf.mxu2 }
 0x168   : > { %v928_v22 = vadd.f32 %v904_v3, %v836_v17 }
 0x169   : > { %v884_v8 = vpop.f32.mrf.mxu1 }
 0x16a   : > { %v927_v23 = vadd.f32 %v884_v8, %v835_v16 }
 0x170   : > { %v924_v11 = vpop.f32.mrf.mxu3 }
 0x171   : > { %v929_v18 = vadd.f32 %v924_v11, %v837_v14 }
 0x177   : > { %v1016_v19 = vpop.f32.mrf.mxu2 }
 0x178   : > { %v1021_v24 = vadd.f32 %v1016_v19, %v929_v18 }
 0x179   : > { %v976_v26 = vpop.f32.mrf.mxu0  ;;  %v996_v27 = vpop.f32.mrf.mxu1 }
 0x17a   : > { %1027 = vst [vmem:[%s1024_s20 + $0x10] sm:$0xff] %v1021_v24  ;;  %v1019_v28 = vadd.f32 %v976_v26, %v927_v23  ;;  %v1020_v29 = vadd.f32 %v996_v27, %v928_v22  ;;  %v1038_v32 = vmul.f32 %v1032_v21, %v1021_v24 }
 0x17c   : > { %1025 = vst [vmem:[%s1024_s20] sm:$0xff] %v1019_v28  ;;  %v1036_v30 = vmul.f32 %v1030_v20, %v1019_v28  ;;  %v1037_v31 = vmul.f32 %v1031_v25, %v1020_v29  ;;  %v1050_v37 = vmul.f32 %v1038_v32, %v1021_v24 }
 0x17d   : > { %1026 = vst [vmem:[%s1024_s20 + $0x8] sm:$0xff] %v1020_v29 }
 0x17e   : > { %v1048_v33 = vmul.f32 %v1036_v30, %v1019_v28  ;;  %v1049_v34 = vmul.f32 %v1037_v31, %v1020_v29  ;;  %v1040_v35 = vadd.f32 %v1037_v31, %v1036_v30 }
 0x180   : > { %v1041_v36 = vadd.f32 %v1040_v35, %v1038_v32  ;;  %v1051_v38 = vadd.f32 %v1049_v34, %v1048_v33 }
 0x182   : > { %1042 = vadd.xlane.f32.xlu1 %v1041_v36  ;;  %v1052_v39 = vadd.f32 %v1051_v38, %v1050_v37 }
 0x184   : > { %1053 = vadd.xlane.f32.xlu2 %v1052_v39 }
 0x1f5   : > { %v1043_v41 = vpop.xlane.xlu1 %1042 }
 0x1f6   : > { %v1044_v43 = vadd.f32 %v1043_v41, %v1039_v40  ;;  %1060 = sbr.rel (%p1259_p6) target bundleno = 663 (0x297), region = 40 }
 0x1f7   : > { %v1054_v44 = vpop.xlane.xlu2 %1053 }
 0x1f8   : > { %1046 = vst.msk [vmem:[#allocation2] sm:$0xff] %vm1045_vm11, %v1044_v43  ;;  %v1055_v45 = vadd.f32 %v1054_v44, %v1047_v42 }
 0x1fa   : > { %1056 = vst.msk [vmem:[#allocation3] sm:$0xff] %vm1045_vm11, %v1055_v45 }
 0x1fb   : > { %v1349_v48 = vmov 0   ;;  %v1078_v62 = vld [vmem:[%s1556_s3] sm:$0xff]  ;;  %v1079_v63 = vld [vmem:[%s1556_s3 + $0x8] sm:$0xff]  ;;  %v1080_v0 = vld [vmem:[%s1556_s3 + $0x10] sm:$0xff] }
 0x1fc   : > { %1306 = vset.pattern.permute.xlu0 %v1349_v48  ;;  %v1081_v1 = vld [vmem:[%s1556_s3 + $0x18] sm:$0xff]  ;;  %v1082_v2 = vld [vmem:[%s1556_s3 + $0x20] sm:$0xff]  ;;  %v1083_v3 = vld [vmem:[%s1556_s3 + $0x28] sm:$0xff] }
 0x1ff   : > { %v1061_v46 = vld [vmem:[#allocation2] sm:$0xff] }
 0x200   : > { %v1062_v49 = vmul.f32 0.001953125, %v1061_v46 }
 0x201   : > { %v1063_v47 = vld [vmem:[#allocation3] sm:$0xff] }
 0x202   : > { %v1064_v50 = vmul.f32 0.001953125, %v1063_v47  ;;  %1086 = vperm.xlu0 %1306, %v1062_v49   ;;  %v1065_v51 = vmul.f32 %v1062_v49, %v1062_v49 }
 0x204   : > { %v1066_v52 = vsub.f32 %v1064_v50, %v1065_v51 }
 0x206   : > { %v1067_v53 = vadd.f32 1e-05, %v1066_v52 }
 0x208   : > { %1307 = vrsqrt.f32 %v1067_v53  ;;  %vm1074_vm12 = vweird.f32 %v1067_v53 }
 0x20e   : > { %v1308_v54 = vpop.eup %1307 }
 0x20f   : > { %v1069_v55 = vmul.f32 %v1308_v54, %v1067_v53  ;;  %vm1075_vm13 = vweird.f32 %v1308_v54 }
 0x210   : > { %vm1076_vm14 = vmor %vm1074_vm12, %vm1075_vm13 }
 0x211   : > { %v1070_v56 = vmul.f32 %v1308_v54, %v1069_v55 }
 0x213   : > { %v1071_v57 = vmul.f32 0.5, %v1070_v56 }
 0x215   : > { %v1072_v58 = vsub.f32 1.5, %v1071_v57 }
 0x217   : > { %v1073_v59 = vmul.f32 %v1308_v54, %v1072_v58 }
 0x219   : > { %v1077_v60 = vsel %vm1076_vm14, %v1308_v54, %v1073_v59 }
 0x21a   : > { %1097 = vperm.xlu0 %1306, %v1077_v60  }
 0x274   : > { %v1087_v61 = vpop.permute.xlu0 %1086 }
 0x275   : > { %v1089_v4 = vsub.f32 %v1078_v62, %v1087_v61  ;;  %v1090_v5 = vsub.f32 %v1079_v63, %v1087_v61  ;;  %v1091_v6 = vsub.f32 %v1080_v0, %v1087_v61  ;;  %v1092_v7 = vsub.f32 %v1081_v1, %v1087_v61 }
 0x276   : > { %v1093_v8 = vsub.f32 %v1082_v2, %v1087_v61  ;;  %v1094_v9 = vsub.f32 %v1083_v3, %v1087_v61 }
 0x28c   : > { %v1098_v10 = vpop.permute.xlu0 %1097 }
 0x28d   : > { %v1100_v11 = vmul.f32 %v1098_v10, %v1089_v4  ;;  %v1101_v12 = vmul.f32 %v1098_v10, %v1090_v5  ;;  %v1102_v13 = vmul.f32 %v1098_v10, %v1091_v6  ;;  %v1103_v14 = vmul.f32 %v1098_v10, %v1092_v7 }
 0x28e   : > { %v1104_v15 = vmul.f32 %v1098_v10, %v1093_v8  ;;  %v1105_v16 = vmul.f32 %v1098_v10, %v1094_v9 }
 0x28f   : > { %v1106_v17 = vmax.f32 %v1100_v11, 0.0  ;;  %v1107_v18 = vmax.f32 %v1101_v12, 0.0  ;;  %v1108_v19 = vmax.f32 %v1102_v13, 0.0  ;;  %v1109_v20 = vmax.f32 %v1103_v14, 0.0 }
 0x290   : > { %v1110_v21 = vmax.f32 %v1104_v15, 0.0  ;;  %v1111_v22 = vmax.f32 %v1105_v16, 0.0 }
 0x291   : > { %1112 = vst [vmem:[%s1556_s3] sm:$0xff] %v1106_v17 }
 0x292   : > { %1113 = vst [vmem:[%s1556_s3 + $0x8] sm:$0xff] %v1107_v18 }
 0x293   : > { %1114 = vst [vmem:[%s1556_s3 + $0x10] sm:$0xff] %v1108_v19 }
 0x294   : > { %1115 = vst [vmem:[%s1556_s3 + $0x18] sm:$0xff] %v1109_v20 }
 0x295   : > { %1116 = vst [vmem:[%s1556_s3 + $0x20] sm:$0xff] %v1110_v21 }
 0x296   : > { %1117 = vst [vmem:[%s1556_s3 + $0x28] sm:$0xff] %v1111_v22 }
 0x297 PF: > { %s13_s14 = sadd.s32 1, %s1331_s14   ;;  %s1557_s12 = smov %s1327_s13 }
 0x298   : > { %p10_p7 = scmp.ge.s32.totalorder %s13_s14, 4   ;;  %s1558_s13 = smov %s1560_s15 }
 0x29a   :  { %12 = sbr.rel (!%p10_p7) target bundleno = 2 (0x2), region = 83 }

</bundles_post_ra>
